<compile_context>
chip_gen: v6e
topology: v6e:2x2x1
jax: 0.10.0
libtpu: 0.0.40
codegen_flags: <defaults>
</compile_context>

<pallas_src>
import functools

import jax
import jax.numpy as jnp
from jax.experimental import pallas as pl
from jax.experimental.pallas import tpu as pltpu

LANES = 128
MAX_BLOCK_ROWS = 4096            # (4096, 128) f32 block = 2 MiB
VMEM_LIMIT_BYTES = 32 * 1024 * 1024


def _round_up(x: int, m: int) -> int:
    return (x + m - 1) // m * m


def _num_tensorcores() -> int:
    """2 TensorCores per chip on v7x; 1 on v5e/v6e. Fallback 1 is always correct."""
    try:
        kind = jax.devices()[0].device_kind.lower()
    except Exception:
        return 1
    return 2 if ("v7" in kind or "7x" in kind) else 1


def _masked_mse_kernel(p_ref, t_ref, m_ref, sse_ref, cnt_ref, *,
                       block_rows: int, tiles_per_core: int, valid_rows: int):
    c = pl.program_id(0)   # core-split index ("parallel"; size 1 on single-TC chips)
    i = pl.program_id(1)   # tile index within this core's slice ("arbitrary")

    # The (8, 128) output blocks stay resident across the inner axis: zero once.
    @pl.when(i == 0)
    def _():
        sse_ref[...] = jnp.zeros_like(sse_ref)
        cnt_ref[...] = jnp.zeros_like(cnt_ref)

    mv = m_ref[...]
    data_mask = mv if mv.dtype == jnp.bool_ else (mv != 0)

    def accumulate(active):
        d = p_ref[...].astype(jnp.float32) - t_ref[...].astype(jnp.float32)
        # select (NOT multiply): garbage NaN/Inf in overhang rows must not leak.
        sq = jnp.where(active, d * d, 0.0)
        one = active.astype(jnp.float32)
        # Fold (block_rows, 128) -> (8, 128): summing the leading axis is pure
        # vreg-wise VALU adds (no per-step cross-lane XLU reduce, no scalar RMW).
        sse_ref[...] += jnp.sum(sq.reshape(block_rows // 8, 8, LANES), axis=0)
        cnt_ref[...] += jnp.sum(one.reshape(block_rows // 8, 8, LANES), axis=0)

    # Logical (unclamped) row range of this tile. Interior tiles (the common case)
    # skip the iota/compare entirely; only the overhanging tail tile and any
    # clamped-duplicate tile pay for row-range masking.
    row_start = (c * tiles_per_core + i) * block_rows
    interior = row_start + block_rows <= valid_rows

    @pl.when(interior)
    def _():
        accumulate(data_mask)

    @pl.when(jnp.logical_not(interior))
    def _():
        row_ids = row_start + jax.lax.broadcasted_iota(
            jnp.int32, (block_rows, LANES), 0)
        accumulate(data_mask & (row_ids < valid_rows))


def masked_mse_loss(y_pred: jax.Array, y_true: jax.Array, mask: jax.Array, *,
                    max_block_rows: int = MAX_BLOCK_ROWS,
                    num_core_splits: int | None = None) -> jax.Array:
    """Pallas implementation of MaskedMSELoss.forward (reduction='mean')."""
    assert y_pred.shape == y_true.shape == mask.shape

    p = y_pred.reshape(-1)
    t = y_true.reshape(-1)
    m = mask.reshape(-1)          # bool stays bool (1 B/elem); no wrapper astype pass

    n = p.shape[0]
    rows0 = pl.cdiv(n, LANES)
    if rows0 < max_block_rows:
        # Small input: a single block equal to the (slightly padded) array.
        rows = _round_up(rows0, 32)          # 32 = 1-byte sublane tile; pad is tiny
        block_rows = rows
    else:
        # Large input: fixed blocks; the last partial block is handled by the
        # in-kernel row-range mask (no whole-array pad copy when lane-aligned).
        rows = rows0
        block_rows = max_block_rows

    n_pad = rows * LANES
    if n_pad != n:
        pad = n_pad - n
        p = jnp.pad(p, (0, pad))
        t = jnp.pad(t, (0, pad))
        m = jnp.pad(m, (0, pad))             # padded mask = 0/False -> ignored

    total_blocks = pl.cdiv(rows, block_rows)
    if num_core_splits is None:
        num_core_splits = _num_tensorcores()
    num_splits = max(1, min(int(num_core_splits), total_blocks))
    tiles_per_core = pl.cdiv(total_blocks, num_splits)
    max_block = total_blocks - 1

    p2 = p.reshape(rows, LANES)
    t2 = t.reshape(rows, LANES)
    m2 = m.reshape(rows, LANES)

    def tile_map(c, i):
        # Clamp so a trailing out-of-range tile (only possible when num_splits > 1
        # and total_blocks is odd) re-reads the previous block index; its
        # contribution is zeroed by the in-kernel row-range mask.
        return (jnp.minimum(c * tiles_per_core + i, max_block), 0)

    tile_spec = pl.BlockSpec((block_rows, LANES), tile_map)
    acc_spec = pl.BlockSpec((8, LANES), lambda c, i: (c, 0))   # lane-dense partials

    kernel = functools.partial(
        _masked_mse_kernel,
        block_rows=block_rows,
        tiles_per_core=tiles_per_core,
        valid_rows=rows,
    )

    in_bytes = (jnp.dtype(y_pred.dtype).itemsize
                + jnp.dtype(y_true.dtype).itemsize
                + jnp.dtype(m.dtype).itemsize) * n_pad
    out_bytes = 2 * num_splits * 8 * LANES * 4
    cost = pl.CostEstimate(flops=4 * n, transcendentals=0,
                           bytes_accessed=in_bytes + out_bytes)

    sse, cnt = pl.pallas_call(
        kernel,
        out_shape=(
            jax.ShapeDtypeStruct((num_splits * 8, LANES), jnp.float32),
            jax.ShapeDtypeStruct((num_splits * 8, LANES), jnp.float32),
        ),
        grid_spec=pltpu.PrefetchScalarGridSpec(
            num_scalar_prefetch=0,
            grid=(num_splits, tiles_per_core),
            in_specs=[tile_spec, tile_spec, tile_spec],
            out_specs=(acc_spec, acc_spec),
        ),
        compiler_params=pltpu.CompilerParams(
            dimension_semantics=("parallel", "arbitrary"),
            vmem_limit_bytes=VMEM_LIMIT_BYTES,
        ),
        cost_estimate=cost,
    )(p2, t2, m2)

    # Tiny final reduction + divide outside the kernel.
    # NOTE: like torch.masked_select(...).mean(), an all-False mask yields NaN.
    return (jnp.sum(sse) / jnp.sum(cnt)).astype(jnp.float32)


if __name__ == "__main__":
    key = jax.random.PRNGKey(0)

    def check(shape, p_mask, ks, **kw):
        k1, k2, k3 = jax.random.split(ks, 3)
        y_pred = jax.random.normal(k1, shape, dtype=jnp.float32)
        y_true = jax.random.normal(k2, shape, dtype=jnp.float32)
        mask = jax.random.bernoulli(k3, p=p_mask, shape=shape)   # bool, passed as-is

        loss = jax.block_until_ready(masked_mse_loss(y_pred, y_true, mask, **kw))

        mf = mask.astype(jnp.float32)
        ref = jnp.sum((y_pred - y_true) ** 2 * mf) / jnp.sum(mf)
        assert jnp.allclose(loss, ref, rtol=1e-4, atol=1e-6), (shape, kw, loss, ref)

    k0, k1, k2, k3 = jax.random.split(key, 4)
    check((2, 8, 32), 0.6, k0)       # base small shape (B=2, T=8, D=32), single block
    check((3, 7, 19), 0.5, k1)       # odd size -> lane pad + zero-mask padding path
    check((8, 64, 300), 0.4, k2,     # multi-block path (small cap for test coverage):
          max_block_rows=64)         #   interior fast path + overhanging tail tile
    check((8, 64, 300), 0.4, k3,     # forced 2-way core split with odd block count:
          max_block_rows=64,         #   exercises the clamped-duplicate tile on any chip
          num_core_splits=2)

    print("KERNEL_OK")
</pallas_src>

<mosaic_0001>
module attributes {stable_mosaic.version = 11 : i64} {
  func.func @_masked_mse_kernel(%arg0: i32, %arg1: i32, %arg2: memref<32x128xf32, #tpu.memory_space<vmem>>, %arg3: memref<32x128xf32, #tpu.memory_space<vmem>>, %arg4: memref<32x128xi32, #tpu.memory_space<vmem>>, %arg5: memref<8x128xf32, #tpu.memory_space<vmem>>, %arg6: memref<8x128xf32, #tpu.memory_space<vmem>>) attributes {dimension_semantics = [#tpu.dimension_semantics<parallel>, #tpu.dimension_semantics<arbitrary>], iteration_bounds = array<i64: 1, 1>, scalar_prefetch = 0 : i64, scratch_operands = 0 : i64, tpu.core_type = #tpu.core_type<tc>, window_params = [{transform_indices = @transform_0, window_bounds = array<i64: 32, 128>}, {transform_indices = @transform_1, window_bounds = array<i64: 32, 128>}, {transform_indices = @transform_2, window_bounds = array<i64: 32, 128>}, {transform_indices = @transform_3, window_bounds = array<i64: 8, 128>}, {transform_indices = @transform_4, window_bounds = array<i64: 8, 128>}]} {
    %c0_i32 = arith.constant 0 : i32
    %0 = arith.cmpi eq, %arg1, %c0_i32 : i32
    %1 = arith.extui %0 : i1 to i32
    %c0_i32_0 = arith.constant 0 : i32
    %2 = arith.cmpi ne, %1, %c0_i32_0 : i32
    scf.if %2 {
      %cst_6 = arith.constant 0.000000e+00 : f32
      %15 = vector.broadcast %cst_6 : f32 to vector<8x128xf32>
      %c0_7 = arith.constant 0 : index
      %c0_8 = arith.constant 0 : index
      %16 = vector.load %arg5[%c0_7, %c0_8] : memref<8x128xf32, #tpu.memory_space<vmem>>, vector<8x128xf32>
      tpu.vector_store %arg5[%c0_7, %c0_8], %15 {strides = array<i32>} : memref<8x128xf32, #tpu.memory_space<vmem>>, vector<8x128xf32>,
      %cst_9 = arith.constant 0.000000e+00 : f32
      %17 = vector.broadcast %cst_9 : f32 to vector<8x128xf32>
      %c0_10 = arith.constant 0 : index
      %c0_11 = arith.constant 0 : index
      %18 = vector.load %arg6[%c0_10, %c0_11] : memref<8x128xf32, #tpu.memory_space<vmem>>, vector<8x128xf32>
      tpu.vector_store %arg6[%c0_10, %c0_11], %17 {strides = array<i32>} : memref<8x128xf32, #tpu.memory_space<vmem>>, vector<8x128xf32>,
    } else {
    }
    %c0 = arith.constant 0 : index
    %c0_1 = arith.constant 0 : index
    %3 = vector.load %arg4[%c0, %c0_1] : memref<32x128xi32, #tpu.memory_space<vmem>>, vector<32x128xi32>
    %cst = arith.constant dense<0> : vector<32x128xi32>
    %4 = arith.cmpi ne, %3, %cst : vector<32x128xi32>
    %c1_i32 = arith.constant 1 : i32
    %5 = arith.muli %arg0, %c1_i32 : i32
    %6 = arith.addi %5, %arg1 : i32
    %c32_i32 = arith.constant 32 : i32
    %7 = arith.muli %6, %c32_i32 : i32
    %c32_i32_2 = arith.constant 32 : i32
    %8 = arith.addi %7, %c32_i32_2 : i32
    %c32_i32_3 = arith.constant 32 : i32
    %9 = arith.cmpi sle, %8, %c32_i32_3 : i32
    %10 = arith.extui %9 : i1 to i32
    %c0_i32_4 = arith.constant 0 : i32
    %11 = arith.cmpi ne, %10, %c0_i32_4 : i32
    scf.if %11 {
      %c0_6 = arith.constant 0 : index
      %c0_7 = arith.constant 0 : index
      %15 = vector.load %arg2[%c0_6, %c0_7] : memref<32x128xf32, #tpu.memory_space<vmem>>, vector<32x128xf32>
      %c0_8 = arith.constant 0 : index
      %c0_9 = arith.constant 0 : index
      %16 = vector.load %arg3[%c0_8, %c0_9] : memref<32x128xf32, #tpu.memory_space<vmem>>, vector<32x128xf32>
      %17 = arith.subf %15, %16 : vector<32x128xf32>
      %18 = arith.mulf %17, %17 : vector<32x128xf32>
      %cst_10 = arith.constant 0.000000e+00 : f32
      %19 = vector.broadcast %cst_10 : f32 to vector<32x128xf32>
      %20 = arith.select %4, %18, %19 : vector<32x128xi1>, vector<32x128xf32>
      %21 = arith.extui %4 : vector<32x128xi1> to vector<32x128xi32>
      %22 = arith.sitofp %21 : vector<32x128xi32> to vector<32x128xf32>
      %c0_11 = arith.constant 0 : index
      %c0_12 = arith.constant 0 : index
      %23 = vector.load %arg5[%c0_11, %c0_12] : memref<8x128xf32, #tpu.memory_space<vmem>>, vector<8x128xf32>
      %24 = vector.shape_cast %20 : vector<32x128xf32> to vector<4x8x128xf32>
      %cst_13 = arith.constant dense<0.000000e+00> : vector<8x128xf32>
      %25 = vector.multi_reduction <add>, %24, %cst_13 [0] : vector<4x8x128xf32> to vector<8x128xf32>
      %26 = arith.addf %23, %25 : vector<8x128xf32>
      %c0_14 = arith.constant 0 : index
      %c0_15 = arith.constant 0 : index
      %27 = vector.load %arg5[%c0_14, %c0_15] : memref<8x128xf32, #tpu.memory_space<vmem>>, vector<8x128xf32>
      tpu.vector_store %arg5[%c0_14, %c0_15], %26 {strides = array<i32>} : memref<8x128xf32, #tpu.memory_space<vmem>>, vector<8x128xf32>,
      %c0_16 = arith.constant 0 : index
      %c0_17 = arith.constant 0 : index
      %28 = vector.load %arg6[%c0_16, %c0_17] : memref<8x128xf32, #tpu.memory_space<vmem>>, vector<8x128xf32>
      %29 = vector.shape_cast %22 : vector<32x128xf32> to vector<4x8x128xf32>
      %cst_18 = arith.constant dense<0.000000e+00> : vector<8x128xf32>
      %30 = vector.multi_reduction <add>, %29, %cst_18 [0] : vector<4x8x128xf32> to vector<8x128xf32>
      %31 = arith.addf %28, %30 : vector<8x128xf32>
      %c0_19 = arith.constant 0 : index
      %c0_20 = arith.constant 0 : index
      %32 = vector.load %arg6[%c0_19, %c0_20] : memref<8x128xf32, #tpu.memory_space<vmem>>, vector<8x128xf32>
      tpu.vector_store %arg6[%c0_19, %c0_20], %31 {strides = array<i32>} : memref<8x128xf32, #tpu.memory_space<vmem>>, vector<8x128xf32>,
    } else {
    }
    %true = arith.constant true
    %12 = arith.xori %9, %true : i1
    %13 = arith.extui %12 : i1 to i32
    %c0_i32_5 = arith.constant 0 : i32
    %14 = arith.cmpi ne, %13, %c0_i32_5 : i32
    scf.if %14 {
      %15 = tpu.iota {dimensions = array<i32: 0>} : vector<32x128xi32>
      %16 = vector.broadcast %7 : i32 to vector<32x128xi32>
      %17 = arith.addi %16, %15 : vector<32x128xi32>
      %c32_i32_6 = arith.constant 32 : i32
      %18 = vector.broadcast %c32_i32_6 : i32 to vector<32x128xi32>
      %19 = arith.cmpi slt, %17, %18 : vector<32x128xi32>
      %20 = arith.andi %4, %19 : vector<32x128xi1>
      %c0_7 = arith.constant 0 : index
      %c0_8 = arith.constant 0 : index
      %21 = vector.load %arg2[%c0_7, %c0_8] : memref<32x128xf32, #tpu.memory_space<vmem>>, vector<32x128xf32>
      %c0_9 = arith.constant 0 : index
      %c0_10 = arith.constant 0 : index
      %22 = vector.load %arg3[%c0_9, %c0_10] : memref<32x128xf32, #tpu.memory_space<vmem>>, vector<32x128xf32>
      %23 = arith.subf %21, %22 : vector<32x128xf32>
      %24 = arith.mulf %23, %23 : vector<32x128xf32>
      %cst_11 = arith.constant 0.000000e+00 : f32
      %25 = vector.broadcast %cst_11 : f32 to vector<32x128xf32>
      %26 = arith.select %20, %24, %25 : vector<32x128xi1>, vector<32x128xf32>
      %27 = arith.extui %20 : vector<32x128xi1> to vector<32x128xi32>
      %28 = arith.sitofp %27 : vector<32x128xi32> to vector<32x128xf32>
      %c0_12 = arith.constant 0 : index
      %c0_13 = arith.constant 0 : index
      %29 = vector.load %arg5[%c0_12, %c0_13] : memref<8x128xf32, #tpu.memory_space<vmem>>, vector<8x128xf32>
      %30 = vector.shape_cast %26 : vector<32x128xf32> to vector<4x8x128xf32>
      %cst_14 = arith.constant dense<0.000000e+00> : vector<8x128xf32>
      %31 = vector.multi_reduction <add>, %30, %cst_14 [0] : vector<4x8x128xf32> to vector<8x128xf32>
      %32 = arith.addf %29, %31 : vector<8x128xf32>
      %c0_15 = arith.constant 0 : index
      %c0_16 = arith.constant 0 : index
      %33 = vector.load %arg5[%c0_15, %c0_16] : memref<8x128xf32, #tpu.memory_space<vmem>>, vector<8x128xf32>
      tpu.vector_store %arg5[%c0_15, %c0_16], %32 {strides = array<i32>} : memref<8x128xf32, #tpu.memory_space<vmem>>, vector<8x128xf32>,
      %c0_17 = arith.constant 0 : index
      %c0_18 = arith.constant 0 : index
      %34 = vector.load %arg6[%c0_17, %c0_18] : memref<8x128xf32, #tpu.memory_space<vmem>>, vector<8x128xf32>
      %35 = vector.shape_cast %28 : vector<32x128xf32> to vector<4x8x128xf32>
      %cst_19 = arith.constant dense<0.000000e+00> : vector<8x128xf32>
      %36 = vector.multi_reduction <add>, %35, %cst_19 [0] : vector<4x8x128xf32> to vector<8x128xf32>
      %37 = arith.addf %34, %36 : vector<8x128xf32>
      %c0_20 = arith.constant 0 : index
      %c0_21 = arith.constant 0 : index
      %38 = vector.load %arg6[%c0_20, %c0_21] : memref<8x128xf32, #tpu.memory_space<vmem>>, vector<8x128xf32>
      tpu.vector_store %arg6[%c0_20, %c0_21], %37 {strides = array<i32>} : memref<8x128xf32, #tpu.memory_space<vmem>>, vector<8x128xf32>,
    } else {
    }
    return
  }
  func.func @transform_0(%arg0: i32, %arg1: i32) -> (i32, i32) {
    %c1_i32 = arith.constant 1 : i32
    %0 = arith.muli %arg0, %c1_i32 : i32
    %1 = arith.addi %0, %arg1 : i32
    %c0_i32 = arith.constant 0 : i32
    %2 = arith.minsi %1, %c0_i32 : i32
    %c0_i32_0 = arith.constant 0 : i32
    %c0_i32_1 = arith.constant 0 : i32
    return %2, %c0_i32_0 : i32, i32
  }
  func.func @transform_1(%arg0: i32, %arg1: i32) -> (i32, i32) {
    %c1_i32 = arith.constant 1 : i32
    %0 = arith.muli %arg0, %c1_i32 : i32
    %1 = arith.addi %0, %arg1 : i32
    %c0_i32 = arith.constant 0 : i32
    %2 = arith.minsi %1, %c0_i32 : i32
    %c0_i32_0 = arith.constant 0 : i32
    %c0_i32_1 = arith.constant 0 : i32
    return %2, %c0_i32_0 : i32, i32
  }
  func.func @transform_2(%arg0: i32, %arg1: i32) -> (i32, i32) {
    %c1_i32 = arith.constant 1 : i32
    %0 = arith.muli %arg0, %c1_i32 : i32
    %1 = arith.addi %0, %arg1 : i32
    %c0_i32 = arith.constant 0 : i32
    %2 = arith.minsi %1, %c0_i32 : i32
    %c0_i32_0 = arith.constant 0 : i32
    %c0_i32_1 = arith.constant 0 : i32
    return %2, %c0_i32_0 : i32, i32
  }
  func.func @transform_3(%arg0: i32, %arg1: i32) -> (i32, i32) {
    %c0_i32 = arith.constant 0 : i32
    %c0_i32_0 = arith.constant 0 : i32
    return %arg0, %c0_i32 : i32, i32
  }
  func.func @transform_4(%arg0: i32, %arg1: i32) -> (i32, i32) {
    %c0_i32 = arith.constant 0 : i32
    %c0_i32_0 = arith.constant 0 : i32
    return %arg0, %c0_i32 : i32, i32
  }
}

</mosaic_0001>

<bundles_post_ra>
// kernel: tpu_custom_call.1
= control target key start
LH: loop header
LB: loop body
LE: loop exit
PB: predicated region body
PF: predicated region fallthrough
CT: control target
= control target key end

     0   :  { %10 = vsyncpa [#allocation3], 0  ;;  %s424_s0 = inlined_call_operand.vmem [shape: f32[32,128], index: 0, kind: input, shape index: {}]   ;;  %s425_s1 = inlined_call_operand.hbm [shape: f32[32,128], index: 1, kind: input, shape index: {}]   ;;  %s426_s2 = inlined_call_operand.vmem [shape: s32[32,128], index: 2, kind: input, shape index: {}]   ;;  %s427_s3 = inlined_call_operand.hbm [shape: f32[8,128], index: 3, kind: output, shape index: {0}]   ;;  %s428_s4 = inlined_call_operand.hbm [shape: f32[8,128], index: 4, kind: output, shape index: {1}]  }
   0x1   :  { %11 = vsyncpa [#allocation4], 0 }
   0x2   :  { %12 = vsyncpa [#allocation7], 0  ;;  %s352_s15 = smov [#allocation2]  }
   0x3   :  { %s38_s16 = sshll.u32 %s352_s15, 4  ;;  %s39_s16 = int_to_ptr.vmem [resolvable:$true] %s38_s16 }
   0x4   :  { %s294_s17 = scalar_lea.vmem %s39_s16, 512  ;;  %p299_p1 = scmp.lt.s32.totalorder %s39_s16, %s39_s16 }
   0x5   :  { %p295_p0 = scmp.ne.s32.totalorder %s39_s16, %s294_s17  ;;  %p300_p2 = scmp.lt.s32.totalorder %s294_s17, %s294_s17 }
   0x7   :  { %p301_p3 = por %p300_p2, %p299_p1 }
   0x9   :  { %p302_p4 = pnand %p301_p3, %p295_p0 }
   0xb   :  { %305 = shalt.err (!%p302_p4)
}
   0xc   :  { %s353_s18 = smov 128   ;;  %s354_s19 = smov 8  }
   0xd   :  { %44 = dma.hbm_to_vmem [thread:$0]  %s425_s1, 512, %s39_s16, [#allocation3], %s353_s18, %s353_s18, %s354_s19  }
   0xe   :  { %346 = dma.done.wait [#allocation3], 512  }
   0xf   :  { %347 = vsyncadd [#allocation3], 4294966784  ;;  %v112_v0 = vld [vmem:[%s426_s2] sm:$0xff]  ;;  %v113_v1 = vld [vmem:[%s426_s2 + $0x8] sm:$0xff]  ;;  %v355_v9 = vmov 0.0   ;;  %s357_s11 = smov [#allocation5]  }
  0x10   :  { %v114_v2 = vld [vmem:[%s426_s2 + $0x10] sm:$0xff]  ;;  %v115_v3 = vld [vmem:[%s426_s2 + $0x18] sm:$0xff]  ;;  %vm116_vm0 = vcmp.ne.s32.totalorder %v112_v0, 0  ;;  %vm117_vm1 = vcmp.ne.s32.totalorder %v113_v1, 0  ;;  %v127_v4 = vld [vmem:[%s424_s0] sm:$0xff]  ;;  %s235_s12 = sshll.u32 %s357_s11, 4  ;;  %s236_s12 = int_to_ptr.vmem [resolvable:$true] %s235_s12 }
  0x11   :  { %vm118_vm2 = vcmp.ne.s32.totalorder %v114_v2, 0  ;;  %v128_v5 = vld [vmem:[%s424_s0 + $0x8] sm:$0xff]  ;;  %vm119_vm3 = vcmp.ne.s32.totalorder %v115_v3, 0  ;;  %v129_v6 = vld [vmem:[%s424_s0 + $0x10] sm:$0xff]  ;;  %v130_v7 = vld [vmem:[%s424_s0 + $0x18] sm:$0xff]  ;;  %v272_v10 = vsel %vm116_vm0, 1.0, %v355_v9 }
  0x12   :  { %v131_v8 = vld [vmem:[#allocation2] sm:$0xff]  ;;  %v273_v11 = vsel %vm117_vm1, 1.0, %v355_v9  ;;  %v132_v12 = vld [vmem:[#allocation2 + $0x8] sm:$0xff]  ;;  %v133_v13 = vld [vmem:[#allocation2 + $0x10] sm:$0xff]  ;;  %v274_v16 = vsel %vm118_vm2, 1.0, %v355_v9  ;;  %v275_v21 = vsel %vm119_vm3, 1.0, %v355_v9 }
  0x13   :  { %v134_v14 = vld [vmem:[#allocation2 + $0x18] sm:$0xff]  ;;  %v135_v15 = vsub.f32 %v127_v4, %v131_v8  ;;  %v162_v17 = vadd.f32 %v273_v11, %v272_v10  ;;  %v136_v18 = vsub.f32 %v128_v5, %v132_v12  ;;  %v137_v19 = vsub.f32 %v129_v6, %v133_v13  ;;  %s356_s0 = smov [#allocation6]  }
  0x14   :  { %v138_v20 = vsub.f32 %v130_v7, %v134_v14  ;;  %s245_s2 = sshll.u32 %s356_s0, 4  ;;  %s246_s2 = int_to_ptr.vmem [resolvable:$true] %s245_s2 }
  0x15   :  { %v139_v22 = vmul.f32 %v135_v15, %v135_v15  ;;  %v163_v23 = vadd.f32 %v274_v16, %v162_v17  ;;  %v140_v24 = vmul.f32 %v136_v18, %v136_v18  ;;  %v141_v25 = vmul.f32 %v137_v19, %v137_v19  ;;  %s306_s13 = scalar_lea.vmem %s246_s2, 128  ;;  %p311_p6 = scmp.lt.s32.totalorder %s246_s2, %s246_s2 }
  0x16   :  { %v142_v26 = vmul.f32 %v138_v20, %v138_v20  ;;  %p307_p5 = scmp.ne.s32.totalorder %s246_s2, %s306_s13  ;;  %p312_p7 = scmp.lt.s32.totalorder %s306_s13, %s306_s13 }
  0x17   :  { %v143_v27 = vsel %vm116_vm0, %v139_v22, 0.0  ;;  %v164_v28 = vadd.f32 %v275_v21, %v163_v23  ;;  %v144_v29 = vsel %vm117_vm1, %v140_v24, 0.0  ;;  %v145_v30 = vsel %vm118_vm2, %v141_v25, 0.0 }
  0x18   :  { %v156_v31 = vadd.f32 %v144_v29, %v143_v27  ;;  %v146_v32 = vsel %vm119_vm3, %v142_v26, 0.0  ;;  %p313_p8 = por %p312_p7, %p311_p6 }
  0x19   :  { %166 = vst [vmem:[#allocation6] sm:$0xff] %v164_v28 }
  0x1a   :  { %v157_v33 = vadd.f32 %v156_v31, %v145_v30  ;;  %p314_p9 = pnand %p313_p8, %p307_p5 }
  0x1c   :  { %317 = shalt.err (!%p314_p9)
}
  0x1d   :  { %248 = dma.vmem_to_hbm [thread:$0]  %s246_s2, 128, %s428_s4, [#allocation7]   ;;  %v158_v34 = vadd.f32 %v157_v33, %v146_v32 }
  0x1e   :  { %s326_s16 = scalar_lea.vmem %s236_s12, 128  ;;  %p331_p11 = scmp.lt.s32.totalorder %s236_s12, %s236_s12 }
  0x1f   :  { %160 = vst [vmem:[#allocation5] sm:$0xff] %v158_v34  ;;  %p327_p10 = scmp.ne.s32.totalorder %s236_s12, %s326_s16  ;;  %p332_p12 = scmp.lt.s32.totalorder %s326_s16, %s326_s16 }
  0x21   :  { %p333_p13 = por %p332_p12, %p331_p11 }
  0x23   :  { %p334_p0 = pnand %p333_p13, %p327_p10 }
  0x25   :  { %337 = shalt.err (!%p334_p0)
}
  0x26   :  { %238 = dma.vmem_to_hbm [thread:$0]  %s236_s12, 128, %s427_s3, [#allocation4]  }
  0x27   :  { %348 = dma.done.wait [#allocation4], 128  }
  0x28   :  { %349 = vsyncadd [#allocation4], 4294967168 }
  0x29   :  { %350 = dma.done.wait [#allocation7], 128  }
  0x2a   :  { %351 = vsyncadd [#allocation7], 4294967168 }
  0x2b   :  { %255 = vsyncpa [#allocation3], 1 }
  0x2c   :  { %256 = vsyncpa [#allocation4], 1 }
  0x2d   :  { %257 = vsyncpa [#allocation7], 1 }

</bundles_post_ra>
